<compile_context>
chip_gen: v6e
topology: v6e:2x2x1
jax: 0.10.0
libtpu: 0.0.40
codegen_flags: <defaults>
</compile_context>

<pallas_src>
import jax
import jax.numpy as jnp
from jax.experimental import pallas as pl
from jax.experimental.pallas import tpu as pltpu


# ----------------------------------------------------------------------------
# Pallas kernel: whole ConvGRU update for batch_tile images in ONE matmul.
# ----------------------------------------------------------------------------
def conv_gru_kernel(
    xh_ref,    # (BT*H, 3*(W+2)*C)      bf16  ky-stacked, zero-padded concat([x, h])
    h_ref,     # (BT*H, W*Cout)         f32   hidden, lanes = w*Cout + co
    wt_ref,    # (3*(W+2)*C, 4*W*Cout)  bf16  block-banded fused conv weight
    b_ref,     # (1, 4*W*Cout)          f32   fused bias [in|hid|upd|rst]
    out_ref,   # (BT*H, W*Cout)         f32   new hidden
):
    gw = out_ref.shape[-1]               # W*Cout (128 at the test shape)

    # All four 3x3 convolutions (input / hidden / update / reset), all three
    # vertical taps and the horizontal taps are folded into one banded weight:
    # a single MXU matmul per grid step, f32 accumulation.
    acc = jnp.dot(xh_ref[...], wt_ref[...],
                  preferred_element_type=jnp.float32) + b_ref[...]

    # Full-128-lane f32 gating (lane-tile-aligned static slices).
    mem_in = acc[:, 0 * gw:1 * gw]
    mem_hid = acc[:, 1 * gw:2 * gw]
    upd = jax.nn.sigmoid(acc[:, 2 * gw:3 * gw])
    rst = jax.nn.sigmoid(acc[:, 3 * gw:4 * gw])
    mem = jnp.maximum(mem_in + rst * mem_hid, 0.0)
    hid = h_ref[...]
    out_ref[...] = upd * hid + (1.0 - upd) * mem          # dense (BT*H, 128) store


# ----------------------------------------------------------------------------
# One-time parameter prep: fuse the four convs into one banded bf16 weight.
# ----------------------------------------------------------------------------
def prepare_conv_gru_params(params, cin, cout, width):
    """Returns {'wt': (3*(W+2)*C, 4*W*Cout) bf16, 'bias': (1, 4*W*Cout) f32}.

    Row layout matches the ky-stacked padded-input lanes:
        ky*(W+2)*C + wp*C + ci
    Column layout: gate*(W*Cout) + w*Cout + co with
        gate 0 = conv_for_input, 1 = conv_for_hidden, 2 = update, 3 = reset.
    """
    f32 = jnp.float32
    c = cin + cout
    wpad = width + 2

    # Zero-block the single-stream convs so all four act on concat([x, h]).
    w_in_full = jnp.concatenate(
        [params["w_in"], jnp.zeros((3, 3, cout, cout), f32)], axis=2)
    w_hid_full = jnp.concatenate(
        [jnp.zeros((3, 3, cin, cout), f32), params["w_hid"]], axis=2)
    wf = jnp.stack(
        [w_in_full, w_hid_full, params["w_upd"], params["w_rst"]], axis=3
    )                                                        # (3,3,C,4,Cout)

    # Band selector: sel[kx, wp, w] = 1 iff wp == w + kx (padding=1 conv).
    sel = (
        jnp.arange(wpad)[None, :, None]
        == (jnp.arange(width)[None, None, :] + jnp.arange(3)[:, None, None])
    ).astype(f32)                                            # (3, W+2, W)

    t6 = jnp.einsum("xpw,yxcgo->ypcgwo", sel, wf)            # (3,W+2,C,4,W,Cout)
    wt = t6.reshape(3 * wpad * c, 4 * width * cout).astype(jnp.bfloat16)

    bias = jnp.concatenate(
        [jnp.tile(params[k], width) for k in ("b_in", "b_hid", "b_upd", "b_rst")]
    ).reshape(1, 4 * width * cout).astype(f32)
    return {"wt": wt, "bias": bias}


# ----------------------------------------------------------------------------
# Wrapper: layout glue + pallas_call.
# ----------------------------------------------------------------------------
def conv_gru_cell(x_nchw, hidden_nchw, fused, *, batch_tile=None):
    """Pallas ConvGruCell forward.  Returns (hidden, hidden) like PyTorch.

    batch_tile=None -> whole batch in one grid step (best on single-TC v5e/v6e).
    On v7x, batch_tile=1 gives each TensorCore one image via the parallel axis.
    """
    n, cin, height, width = x_nchw.shape
    cout = hidden_nchw.shape[1]
    c = cin + cout
    wpad = width + 2
    gw = width * cout                      # 128 at the test shape -> lane dense
    kdim = 3 * wpad * c                    # fused K (all three vertical taps)

    if batch_tile is None:
        batch_tile = n
    assert n % batch_tile == 0, "batch must be a multiple of batch_tile"

    x = jnp.transpose(x_nchw, (0, 2, 3, 1)).astype(jnp.float32)      # NHWC
    h = jnp.transpose(hidden_nchw, (0, 2, 3, 1)).astype(jnp.float32)

    # torch.cat([x, hidden], dim=1) -> channel-last concat, pad H/W by 1,
    # then pre-stack the 3 vertical taps into the K dimension so the kernel
    # needs exactly one matmul per grid step.  bf16 matmul operands.
    xh = jnp.concatenate([x, h], axis=-1)
    xh = jnp.pad(xh, ((0, 0), (1, 1), (1, 1), (0, 0)))                # (N,H+2,W+2,C)
    xh = jnp.stack([xh[:, ky:ky + height] for ky in range(3)], axis=2)  # (N,H,3,W+2,C)
    xh = xh.reshape(n * height, kdim).astype(jnp.bfloat16)            # (N*H, 3*(W+2)*C)

    h_flat = h.reshape(n * height, gw)                                # (N*H, W*Cout) f32

    wt, bias = fused["wt"], fused["bias"]
    mt = batch_tile * height               # matmul M per grid step
    grid = (n // batch_tile,)

    out = pl.pallas_call(
        conv_gru_kernel,
        out_shape=jax.ShapeDtypeStruct((n * height, gw), jnp.float32),
        grid_spec=pltpu.PrefetchScalarGridSpec(
            num_scalar_prefetch=0,
            grid=grid,
            in_specs=[
                pl.BlockSpec((mt, kdim), lambda i: (i, 0)),
                pl.BlockSpec((mt, gw), lambda i: (i, 0)),
                # Constant index_maps: fetched once, VMEM-resident for the grid.
                pl.BlockSpec(wt.shape, lambda i: (0, 0)),
                pl.BlockSpec(bias.shape, lambda i: (0, 0)),
            ],
            out_specs=pl.BlockSpec((mt, gw), lambda i: (i, 0)),
        ),
        compiler_params=pltpu.CompilerParams(
            dimension_semantics=("parallel",),   # shards across TCs if grid > 1
            vmem_limit_bytes=32 * 1024 * 1024,   # ample; safe on v5e/v6e/v7x
        ),
    )(xh, h_flat, wt, bias)

    new_hidden = jnp.transpose(out.reshape(n, height, width, cout), (0, 3, 1, 2))
    return new_hidden, new_hidden


# ----------------------------------------------------------------------------
# Deterministic parameter init (PyTorch Conv2d-style uniform) + reference.
# ----------------------------------------------------------------------------
def init_params(key, cin, cout):
    def conv_init(key, ci, co):
        kw, kb = jax.random.split(key)
        fan_in = ci * 3 * 3
        bound = 1.0 / jnp.sqrt(fan_in)
        w = jax.random.uniform(kw, (3, 3, ci, co), jnp.float32, -bound, bound)
        b = jax.random.uniform(kb, (co,), jnp.float32, -bound, bound)
        return w, b

    ks = jax.random.split(key, 4)
    w_in, b_in = conv_init(ks[0], cin, cout)
    w_hid, b_hid = conv_init(ks[1], cout, cout)
    w_upd, b_upd = conv_init(ks[2], cin + cout, cout)
    w_rst, b_rst = conv_init(ks[3], cin + cout, cout)
    return dict(
        w_in=w_in, b_in=b_in,
        w_hid=w_hid, b_hid=b_hid,
        w_upd=w_upd, b_upd=b_upd,
        w_rst=w_rst, b_rst=b_rst,
    )


def reference_conv_gru(x_nchw, hidden_nchw, params):
    """Pure-JAX f32 reference (lax.conv) mirroring the PyTorch forward."""
    x = jnp.transpose(x_nchw, (0, 2, 3, 1))
    h = jnp.transpose(hidden_nchw, (0, 2, 3, 1))
    dn = ("NHWC", "HWIO", "NHWC")

    def conv(inp, w, b):
        out = jax.lax.conv_general_dilated(
            inp, w, (1, 1), ((1, 1), (1, 1)), dimension_numbers=dn
        )
        return out + b

    cat = jnp.concatenate([x, h], axis=-1)
    upd = jax.nn.sigmoid(conv(cat, params["w_upd"], params["b_upd"]))
    rst = jax.nn.sigmoid(conv(cat, params["w_rst"], params["b_rst"]))
    mem_in = conv(x, params["w_in"], params["b_in"])
    mem_hid = conv(h, params["w_hid"], params["b_hid"])
    mem = jnp.maximum(mem_in + rst * mem_hid, 0.0)
    new_h = upd * h + (1.0 - upd) * mem
    return jnp.transpose(new_h, (0, 3, 1, 2))


if __name__ == "__main__":
    N, CIN, COUT, H, W = 2, 4, 8, 16, 16

    key = jax.random.PRNGKey(0)
    k_x, k_h, k_p = jax.random.split(key, 3)
    x = jax.random.normal(k_x, (N, CIN, H, W), jnp.float32)
    hidden = jax.random.normal(k_h, (N, COUT, H, W), jnp.float32)
    params = init_params(k_p, CIN, COUT)

    # Weight fusion is done once per layer (amortized across recurrent steps).
    fused = prepare_conv_gru_params(params, CIN, COUT, W)

    fwd = jax.jit(conv_gru_cell)           # default batch_tile=N -> grid=(1,)
    new_hidden, out2 = fwd(x, hidden, fused)
    new_hidden = jax.block_until_ready(new_hidden)

    ref = reference_conv_gru(x, hidden, params)
    assert new_hidden.shape == (N, COUT, H, W)
    max_err = float(jnp.max(jnp.abs(new_hidden - ref)))
    # bf16 matmul operands + f32 accumulation/gating vs. pure-f32 reference.
    assert jnp.allclose(new_hidden, ref, atol=2e-2, rtol=2e-2), max_err

    print("KERNEL_OK")
</pallas_src>

<mosaic_0001>
module attributes {stable_mosaic.version = 11 : i64} {
  func.func @conv_gru_kernel(%arg0: i32, %arg1: memref<32x648xbf16, #tpu.memory_space<vmem>>, %arg2: memref<32x128xf32, #tpu.memory_space<vmem>>, %arg3: memref<648x512xbf16, #tpu.memory_space<vmem>>, %arg4: memref<1x512xf32, #tpu.memory_space<vmem>>, %arg5: memref<32x128xf32, #tpu.memory_space<vmem>>) attributes {dimension_semantics = [#tpu.dimension_semantics<parallel>], iteration_bounds = array<i64: 1>, scalar_prefetch = 0 : i64, scratch_operands = 0 : i64, tpu.core_type = #tpu.core_type<tc>, window_params = [{transform_indices = @transform_0, window_bounds = array<i64: 32, 648>}, {transform_indices = @transform_1, window_bounds = array<i64: 32, 128>}, {pipeline_mode = #tpu.pipeline_mode<synchronous>, transform_indices = @transform_2, window_bounds = array<i64: 648, 512>}, {pipeline_mode = #tpu.pipeline_mode<synchronous>, transform_indices = @transform_3, window_bounds = array<i64: 1, 512>}, {transform_indices = @transform_4, window_bounds = array<i64: 32, 128>}]} {
    %c0 = arith.constant 0 : index
    %c0_0 = arith.constant 0 : index
    %0 = vector.load %arg1[%c0, %c0_0] : memref<32x648xbf16, #tpu.memory_space<vmem>>, vector<32x648xbf16>
    %c0_1 = arith.constant 0 : index
    %c0_2 = arith.constant 0 : index
    %1 = vector.load %arg3[%c0_1, %c0_2] : memref<648x512xbf16, #tpu.memory_space<vmem>>, vector<648x512xbf16>
    %cst = arith.constant dense<0.000000e+00> : vector<32x512xf32>
    %2 = tpu.matmul %0, %1, %cst {dimension_numbers = #tpu.dot_dimension_numbers<[1], [0], [0], [1], [0, 0, 1, 1], [], []>} : vector<32x648xbf16>, vector<648x512xbf16>, vector<32x512xf32> -> vector<32x512xf32>
    %c0_3 = arith.constant 0 : index
    %c0_4 = arith.constant 0 : index
    %3 = vector.load %arg4[%c0_3, %c0_4] : memref<1x512xf32, #tpu.memory_space<vmem>>, vector<1x512xf32>
    %4 = vector.broadcast %3 : vector<1x512xf32> to vector<32x512xf32>
    %5 = arith.addf %2, %4 : vector<32x512xf32>
    %6 = vector.extract_strided_slice %5 {offsets = [0, 0], sizes = [32, 128], strides = [1, 1]} : vector<32x512xf32> to vector<32x128xf32>
    %7 = vector.extract_strided_slice %5 {offsets = [0, 128], sizes = [32, 128], strides = [1, 1]} : vector<32x512xf32> to vector<32x128xf32>
    %8 = vector.extract_strided_slice %5 {offsets = [0, 256], sizes = [32, 128], strides = [1, 1]} : vector<32x512xf32> to vector<32x128xf32>
    %9 = arith.negf %8 : vector<32x128xf32>
    %10 = math.exp %9 : vector<32x128xf32>
    %cst_5 = arith.constant 1.000000e+00 : f32
    %11 = vector.broadcast %cst_5 : f32 to vector<32x128xf32>
    %12 = arith.addf %11, %10 : vector<32x128xf32>
    %13 = arith.divf %11, %12 : vector<32x128xf32>
    %14 = vector.extract_strided_slice %5 {offsets = [0, 384], sizes = [32, 128], strides = [1, 1]} : vector<32x512xf32> to vector<32x128xf32>
    %15 = arith.negf %14 : vector<32x128xf32>
    %16 = math.exp %15 : vector<32x128xf32>
    %cst_6 = arith.constant 1.000000e+00 : f32
    %17 = vector.broadcast %cst_6 : f32 to vector<32x128xf32>
    %18 = arith.addf %17, %16 : vector<32x128xf32>
    %19 = arith.divf %17, %18 : vector<32x128xf32>
    %20 = arith.mulf %19, %7 : vector<32x128xf32>
    %21 = arith.addf %6, %20 : vector<32x128xf32>
    %cst_7 = arith.constant 0.000000e+00 : f32
    %22 = vector.broadcast %cst_7 : f32 to vector<32x128xf32>
    %23 = arith.maximumf %21, %22 : vector<32x128xf32>
    %c0_8 = arith.constant 0 : index
    %c0_9 = arith.constant 0 : index
    %24 = vector.load %arg2[%c0_8, %c0_9] : memref<32x128xf32, #tpu.memory_space<vmem>>, vector<32x128xf32>
    %25 = arith.mulf %13, %24 : vector<32x128xf32>
    %cst_10 = arith.constant 1.000000e+00 : f32
    %26 = vector.broadcast %cst_10 : f32 to vector<32x128xf32>
    %27 = arith.subf %26, %13 : vector<32x128xf32>
    %28 = arith.mulf %27, %23 : vector<32x128xf32>
    %29 = arith.addf %25, %28 : vector<32x128xf32>
    %c0_11 = arith.constant 0 : index
    %c0_12 = arith.constant 0 : index
    %30 = vector.load %arg5[%c0_11, %c0_12] : memref<32x128xf32, #tpu.memory_space<vmem>>, vector<32x128xf32>
    tpu.vector_store %arg5[%c0_11, %c0_12], %29 {strides = array<i32>} : memref<32x128xf32, #tpu.memory_space<vmem>>, vector<32x128xf32>,
    return
  }
  func.func @transform_0(%arg0: i32) -> (i32, i32) {
    %c0_i32 = arith.constant 0 : i32
    %c0_i32_0 = arith.constant 0 : i32
    return %arg0, %c0_i32 : i32, i32
  }
  func.func @transform_1(%arg0: i32) -> (i32, i32) {
    %c0_i32 = arith.constant 0 : i32
    %c0_i32_0 = arith.constant 0 : i32
    return %arg0, %c0_i32 : i32, i32
  }
  func.func @transform_2(%arg0: i32) -> (i32, i32) {
    %c0_i32 = arith.constant 0 : i32
    %c0_i32_0 = arith.constant 0 : i32
    %c0_i32_1 = arith.constant 0 : i32
    return %c0_i32, %c0_i32_0 : i32, i32
  }
  func.func @transform_3(%arg0: i32) -> (i32, i32) {
    %c0_i32 = arith.constant 0 : i32
    %c0_i32_0 = arith.constant 0 : i32
    %c0_i32_1 = arith.constant 0 : i32
    return %c0_i32, %c0_i32_0 : i32, i32
  }
  func.func @transform_4(%arg0: i32) -> (i32, i32) {
    %c0_i32 = arith.constant 0 : i32
    %c0_i32_0 = arith.constant 0 : i32
    return %arg0, %c0_i32 : i32, i32
  }
}

</mosaic_0001>

<bundles_post_ra>
// kernel: conv_gru_cell.1
= control target key start
LH: loop header
LB: loop body
LE: loop exit
PB: predicated region body
PF: predicated region fallthrough
CT: control target
= control target key end

     0   :  { %vm1082_vm0 = vcmask 64512   ;;  %vm1089_vm1 = vcmask 1043456   ;;  %s2694_s2 = inlined_call_operand.vmem [shape: bf16[648,512], index: 2, kind: input, shape index: {}]   ;;  %s2695_s0 = inlined_call_operand.vmem [shape: bf16[32,648], index: 0, kind: input, shape index: {}]   ;;  %s2696_s3 = inlined_call_operand.vmem [shape: f32[1,512], index: 3, kind: input, shape index: {}]   ;;  %s2697_s1 = inlined_call_operand.vmem [shape: f32[32,128], index: 1, kind: input, shape index: {}]   ;;  %s2698_s4 = inlined_call_operand.vmem [shape: f32[32,128], index: 4, kind: output, shape index: {}]  }
   0x1   :  { %v1698_v0 = vld [vmem:[%s2694_s2 + $0xe4] ss:$16 sps:$4 sm:$0xff]   ;;  %v1702_v2 = vld [vmem:[%s2694_s2 + $0xe0] ss:$16 sps:$4 sm:$0xff]  }
   0x2   :  { %v1700_v1 = vld [vmem:[%s2694_s2 + $0x2e4] ss:$16 sps:$4 sm:$0xff]   ;;  %1102 = vmatprep.subr.bf16.mxu0 %v1698_v0  ;;  %v1703_v3 = vld [vmem:[%s2694_s2 + $0x2e0] ss:$16 sps:$4 sm:$0xff]  }
   0x3   :  { %1155 = vmatprep.subr.bf16.mxu1 %v1700_v1  ;;  %v1704_v4 = vld [vmem:[%s2694_s2 + $0xc4] ss:$16 sps:$4 sm:$0xff]   ;;  %1103 = vmatpush1.bf16.msra.mxu0 %v1702_v2  ;;  %v1708_v6 = vld [vmem:[%s2694_s2 + $0xc0] ss:$16 sps:$4 sm:$0xff]  }
   0x4   :  { %1156 = vmatpush1.bf16.msra.mxu1 %v1703_v3  ;;  %v1706_v5 = vld [vmem:[%s2694_s2 + $0x2c4] ss:$16 sps:$4 sm:$0xff]   ;;  %1104 = vmatprep.subr.bf16.mxu0 %v1704_v4  ;;  %v1709_v7 = vld [vmem:[%s2694_s2 + $0x2c0] ss:$16 sps:$4 sm:$0xff]   ;;  %v1805_v3 = vld [vmem:[%s2694_s2 + $0xec] ss:$16 sps:$4 sm:$0xff]  }
   0x5   :  { %1157 = vmatprep.subr.bf16.mxu1 %v1706_v5  ;;  %v1710_v8 = vld [vmem:[%s2694_s2 + $0xa4] ss:$16 sps:$4 sm:$0xff]   ;;  %v1714_v10 = vld [vmem:[%s2694_s2 + $0xa0] ss:$16 sps:$4 sm:$0xff]  }
   0x6   :  { %v1712_v9 = vld [vmem:[%s2694_s2 + $0x2a4] ss:$16 sps:$4 sm:$0xff]   ;;  %v1715_v11 = vld [vmem:[%s2694_s2 + $0x2a0] ss:$16 sps:$4 sm:$0xff]  }
   0x7   :  { %1105 = vmatpush1.bf16.msra.mxu0 %v1708_v6  ;;  %v1716_v12 = vld [vmem:[%s2694_s2 + $0x84] ss:$16 sps:$4 sm:$0xff]   ;;  %v1720_v14 = vld [vmem:[%s2694_s2 + $0x80] ss:$16 sps:$4 sm:$0xff]  }
   0x8   :  { %1158 = vmatpush1.bf16.msra.mxu1 %v1709_v7  ;;  %1106 = vmatprep.subr.bf16.mxu0 %v1710_v8  ;;  %v1718_v13 = vld [vmem:[%s2694_s2 + $0x284] ss:$16 sps:$4 sm:$0xff]   ;;  %v1721_v15 = vld [vmem:[%s2694_s2 + $0x280] ss:$16 sps:$4 sm:$0xff]   ;;  %v1803_v7 = vld [vmem:[%s2694_s2 + $0xe8] ss:$16 sps:$4 sm:$0xff]  }
   0x9   :  { %1159 = vmatprep.subr.bf16.mxu1 %v1712_v9  ;;  %v1722_v16 = vld [vmem:[%s2694_s2 + $0x64] ss:$16 sps:$4 sm:$0xff]   ;;  %v1726_v18 = vld [vmem:[%s2694_s2 + $0x60] ss:$16 sps:$4 sm:$0xff]   ;;  %v1811_v9 = vld [vmem:[%s2694_s2 + $0xcc] ss:$16 sps:$4 sm:$0xff]  }
   0xa   :  { %v1724_v17 = vld [vmem:[%s2694_s2 + $0x264] ss:$16 sps:$4 sm:$0xff]   ;;  %v1727_v19 = vld [vmem:[%s2694_s2 + $0x260] ss:$16 sps:$4 sm:$0xff]  }
   0xb   :  { %1107 = vmatpush1.bf16.msra.mxu0 %v1714_v10  ;;  %v1728_v20 = vld [vmem:[%s2694_s2 + $0x44] ss:$16 sps:$4 sm:$0xff]   ;;  %v1732_v22 = vld [vmem:[%s2694_s2 + $0x40] ss:$16 sps:$4 sm:$0xff]  }
   0xc   :  { %1160 = vmatpush1.bf16.msra.mxu1 %v1715_v11  ;;  %1108 = vmatprep.subr.bf16.mxu0 %v1716_v12  ;;  %v1730_v21 = vld [vmem:[%s2694_s2 + $0x244] ss:$16 sps:$4 sm:$0xff]   ;;  %v1733_v23 = vld [vmem:[%s2694_s2 + $0x240] ss:$16 sps:$4 sm:$0xff]  }
   0xd   :  { %1161 = vmatprep.subr.bf16.mxu1 %v1718_v13  ;;  %v1734_v24 = vld [vmem:[%s2694_s2 + $0x24] ss:$16 sps:$4 sm:$0xff]   ;;  %v1738_v26 = vld [vmem:[%s2694_s2 + $0x20] ss:$16 sps:$4 sm:$0xff]   ;;  %v1809_v13 = vld [vmem:[%s2694_s2 + $0xc8] ss:$16 sps:$4 sm:$0xff]  }
   0xe   :  { %v1736_v25 = vld [vmem:[%s2694_s2 + $0x224] ss:$16 sps:$4 sm:$0xff]   ;;  %v1739_v27 = vld [vmem:[%s2694_s2 + $0x220] ss:$16 sps:$4 sm:$0xff]  }
   0xf   :  { %1109 = vmatpush1.bf16.msra.mxu0 %v1720_v14  ;;  %v1740_v28 = vld [vmem:[%s2694_s2 + $0x4] ss:$16 sps:$4 sm:$0xff]   ;;  %v1744_v30 = vld [vmem:[%s2694_s2] ss:$16 sps:$4 sm:$0xff]  }
  0x10   :  { %1162 = vmatpush1.bf16.msra.mxu1 %v1721_v15  ;;  %1110 = vmatprep.subr.bf16.mxu0 %v1722_v16  ;;  %v1742_v29 = vld [vmem:[%s2694_s2 + $0x204] ss:$16 sps:$4 sm:$0xff]   ;;  %v1745_v31 = vld [vmem:[%s2694_s2 + $0x200] ss:$16 sps:$4 sm:$0xff]   ;;  %v1817_v15 = vld [vmem:[%s2694_s2 + $0xac] ss:$16 sps:$4 sm:$0xff]  }
  0x11   :  { %1163 = vmatprep.subr.bf16.mxu1 %v1724_v17  ;;  %v1746_v32 = vld [vmem:[%s2694_s2 + $0x1e4] ss:$16 sps:$4 sm:$0xff]   ;;  %v1750_v34 = vld [vmem:[%s2694_s2 + $0x1e0] ss:$16 sps:$4 sm:$0xff]  }
  0x12   :  { %v1748_v33 = vld [vmem:[%s2694_s2 + $0x3e4] ss:$16 sps:$4 sm:$0xff]   ;;  %v1751_v35 = vld [vmem:[%s2694_s2 + $0x3e0] ss:$16 sps:$4 sm:$0xff]  }
  0x13   :  { %1111 = vmatpush1.bf16.msra.mxu0 %v1726_v18  ;;  %v1752_v36 = vld [vmem:[%s2694_s2 + $0x1c4] ss:$16 sps:$4 sm:$0xff]   ;;  %v1756_v38 = vld [vmem:[%s2694_s2 + $0x1c0] ss:$16 sps:$4 sm:$0xff]  }
  0x14   :  { %1164 = vmatpush1.bf16.msra.mxu1 %v1727_v19  ;;  %1112 = vmatprep.subr.bf16.mxu0 %v1728_v20  ;;  %v1754_v37 = vld [vmem:[%s2694_s2 + $0x3c4] ss:$16 sps:$4 sm:$0xff]   ;;  %v1757_v39 = vld [vmem:[%s2694_s2 + $0x3c0] ss:$16 sps:$4 sm:$0xff]   ;;  %v1815_v19 = vld [vmem:[%s2694_s2 + $0xa8] ss:$16 sps:$4 sm:$0xff]  }
  0x15   :  { %1165 = vmatprep.subr.bf16.mxu1 %v1730_v21  ;;  %v1758_v40 = vld [vmem:[%s2694_s2 + $0x1a4] ss:$16 sps:$4 sm:$0xff]   ;;  %v1762_v42 = vld [vmem:[%s2694_s2 + $0x1a0] ss:$16 sps:$4 sm:$0xff]   ;;  %v1823_v21 = vld [vmem:[%s2694_s2 + $0x8c] ss:$16 sps:$4 sm:$0xff]  }
  0x16   :  { %v1760_v41 = vld [vmem:[%s2694_s2 + $0x3a4] ss:$16 sps:$4 sm:$0xff]   ;;  %v1763_v43 = vld [vmem:[%s2694_s2 + $0x3a0] ss:$16 sps:$4 sm:$0xff]  }
  0x17   :  { %1113 = vmatpush1.bf16.msra.mxu0 %v1732_v22  ;;  %v1764_v44 = vld [vmem:[%s2694_s2 + $0x184] ss:$16 sps:$4 sm:$0xff]   ;;  %v1768_v46 = vld [vmem:[%s2694_s2 + $0x180] ss:$16 sps:$4 sm:$0xff]  }
  0x18   :  { %1166 = vmatpush1.bf16.msra.mxu1 %v1733_v23  ;;  %1114 = vmatprep.subr.bf16.mxu0 %v1734_v24  ;;  %v1766_v45 = vld [vmem:[%s2694_s2 + $0x384] ss:$16 sps:$4 sm:$0xff]   ;;  %v1769_v47 = vld [vmem:[%s2694_s2 + $0x380] ss:$16 sps:$4 sm:$0xff]   ;;  %v1821_v24 = vld [vmem:[%s2694_s2 + $0x88] ss:$16 sps:$4 sm:$0xff]  }
  0x19   :  { %1167 = vmatprep.subr.bf16.mxu1 %v1736_v25  ;;  %v1770_v48 = vld [vmem:[%s2694_s2 + $0x164] ss:$16 sps:$4 sm:$0xff]   ;;  %v1774_v52 = vld [vmem:[%s2694_s2 + $0x160] ss:$16 sps:$4 sm:$0xff]  }
  0x1a   :  { %v2167_v49 = vld [vmem:[%s2695_s0 + $0x4] ss:$24 sps:$4 sm:$0xff]   ;;  %v1775_v53 = vld [vmem:[%s2694_s2 + $0x360] ss:$16 sps:$4 sm:$0xff]   ;;  %v2252_v10 = vld [vmem:[%s2695_s0 + $0x34] ss:$24 sps:$4 sm:$0xff]  }
  0x1b   :  { %1115 = vmatpush1.bf16.msra.mxu0 %v1738_v26  ;;  %v1772_v50 = vld [vmem:[%s2694_s2 + $0x364] ss:$16 sps:$4 sm:$0xff]   ;;  %1134 = vmatprep.mubr.bf16.mxu0 %v2167_v49  ;;  %v1780_v56 = vld [vmem:[%s2694_s2 + $0x140] ss:$16 sps:$4 sm:$0xff]   ;;  %v1829_v26 = vld [vmem:[%s2694_s2 + $0x6c] ss:$16 sps:$4 sm:$0xff]  }
  0x1c   :  { %1168 = vmatpush1.bf16.msra.mxu1 %v1739_v27  ;;  %1116 = vmatprep.subr.bf16.mxu0 %v1740_v28  ;;  %v2175_v51 = vld [vmem:[%s2695_s0 + $0xc] ss:$24 sps:$4 sm:$0xff]   ;;  %v1781_v57 = vld [vmem:[%s2694_s2 + $0x340] ss:$16 sps:$4 sm:$0xff]   ;;  %v2257_v11 = vld [vmem:[%s2695_s0 + $0x3c] ss:$24 sps:$4 sm:$0xff]  }
  0x1d   :  { %1169 = vmatprep.subr.bf16.mxu1 %v1742_v29  ;;  %1187 = vmatprep.mubr.bf16.mxu1 %v2175_v51  ;;  %v1776_v54 = vld [vmem:[%s2694_s2 + $0x144] ss:$16 sps:$4 sm:$0xff]   ;;  %v1786_v60 = vld [vmem:[%s2694_s2 + $0x120] ss:$16 sps:$4 sm:$0xff]   ;;  %v1827_v28 = vld [vmem:[%s2694_s2 + $0x68] ss:$16 sps:$4 sm:$0xff]  }
  0x1e   :  { %v1778_v55 = vld [vmem:[%s2694_s2 + $0x344] ss:$16 sps:$4 sm:$0xff]   ;;  %v1787_v61 = vld [vmem:[%s2694_s2 + $0x320] ss:$16 sps:$4 sm:$0xff]  }
  0x1f   :  { %1117 = vmatpush1.bf16.msra.mxu0 %v1744_v30  ;;  %v1782_v58 = vld [vmem:[%s2694_s2 + $0x124] ss:$16 sps:$4 sm:$0xff]   ;;  %v1792_v0 = vld [vmem:[%s2694_s2 + $0x100] ss:$16 sps:$4 sm:$0xff]   ;;  %v1835_v30 = vld [vmem:[%s2694_s2 + $0x4c] ss:$16 sps:$4 sm:$0xff]  }
  0x20   :  { %1170 = vmatpush1.bf16.msra.mxu1 %v1745_v31  ;;  %1118 = vmatprep.subr.bf16.mxu0 %v1746_v32  ;;  %v1784_v59 = vld [vmem:[%s2694_s2 + $0x324] ss:$16 sps:$4 sm:$0xff]   ;;  %v1793_v1 = vld [vmem:[%s2694_s2 + $0x300] ss:$16 sps:$4 sm:$0xff]   ;;  %v1833_v32 = vld [vmem:[%s2694_s2 + $0x48] ss:$16 sps:$4 sm:$0xff]  }
  0x21   :  { %1171 = vmatprep.subr.bf16.mxu1 %v1748_v33  ;;  %v1788_v62 = vld [vmem:[%s2694_s2 + $0x104] ss:$16 sps:$4 sm:$0xff]   ;;  %v2230_v4 = vld [vmem:[%s2695_s0] ss:$24 sps:$4 sm:$0xff]   ;;  %v2280_v17 = vld [vmem:[%s2695_s0 + $0x30] ss:$24 sps:$4 sm:$0xff]  }
  0x22   :  { %v1790_v63 = vld [vmem:[%s2694_s2 + $0x304] ss:$16 sps:$4 sm:$0xff]   ;;  %v2235_v5 = vld [vmem:[%s2695_s0 + $0x8] ss:$24 sps:$4 sm:$0xff]   ;;  %v2286_v18 = vld [vmem:[%s2695_s0 + $0x38] ss:$24 sps:$4 sm:$0xff]  }
  0x23   :  { %1119 = vmatpush2.bf16.msra.mxu0 %v1750_v34  ;;  %v1802_v2 = vld [vmem:[%s2694_s2 + $0x4e4] ss:$16 sps:$4 sm:$0xff]   ;;  %v1800_v6 = vld [vmem:[%s2694_s2 + $0x4e0] ss:$16 sps:$4 sm:$0xff]   ;;  %v1846_v34 = vld [vmem:[%s2694_s2 + $0x2c] ss:$16 sps:$4 sm:$0xff]  }
  0x24   :  { %1172 = vmatpush2.bf16.msra.mxu1 %v1751_v35  ;;  %1120 = vmatprep.subr.bf16.mxu0 %v1752_v36  ;;  %v1808_v8 = vld [vmem:[%s2694_s2 + $0x4c4] ss:$16 sps:$4 sm:$0xff]   ;;  %v1806_v12 = vld [vmem:[%s2694_s2 + $0x4c0] ss:$16 sps:$4 sm:$0xff]   ;;  %v1844_v36 = vld [vmem:[%s2694_s2 + $0x28] ss:$16 sps:$4 sm:$0xff]  }
  0x25   :  { %1173 = vmatprep.subr.bf16.mxu1 %v1754_v37  ;;  %v1814_v14 = vld [vmem:[%s2694_s2 + $0x4a4] ss:$16 sps:$4 sm:$0xff]   ;;  %v1812_v16 = vld [vmem:[%s2694_s2 + $0x4a0] ss:$16 sps:$4 sm:$0xff]  }
  0x26   :  { %v1820_v20 = vld [vmem:[%s2694_s2 + $0x484] ss:$16 sps:$4 sm:$0xff]   ;;  %v1818_v23 = vld [vmem:[%s2694_s2 + $0x480] ss:$16 sps:$4 sm:$0xff]  }
  0x27   :  { %1121 = vmatpush2.bf16.msra.mxu0 %v1756_v38  ;;  %v2300_v22 = vld [vmem:[%s2695_s0 + $0x14] ss:$24 sps:$4 sm:$0xff]   ;;  %v1824_v27 = vld [vmem:[%s2694_s2 + $0x460] ss:$16 sps:$4 sm:$0xff]  }
  0x28   :  { %1174 = vmatpush2.bf16.msra.mxu1 %v1757_v39  ;;  %1122 = vmatprep.subr.bf16.mxu0 %v1758_v40  ;;  %v1826_v25 = vld [vmem:[%s2694_s2 + $0x464] ss:$16 sps:$4 sm:$0xff]   ;;  %v1830_v31 = vld [vmem:[%s2694_s2 + $0x440] ss:$16 sps:$4 sm:$0xff]   ;;  %v1853_v38 = vld [vmem:[%s2694_s2 + $0xc] ss:$16 sps:$4 sm:$0xff]  }
  0x29   :  { %1175 = vmatprep.subr.bf16.mxu1 %v1760_v41  ;;  %v1832_v29 = vld [vmem:[%s2694_s2 + $0x444] ss:$16 sps:$4 sm:$0xff]   ;;  %v1841_v35 = vld [vmem:[%s2694_s2 + $0x420] ss:$16 sps:$4 sm:$0xff]   ;;  %v1851_v41 = vld [vmem:[%s2694_s2 + $0x8] ss:$16 sps:$4 sm:$0xff]  }
  0x2a   :  { %v1843_v33 = vld [vmem:[%s2694_s2 + $0x424] ss:$16 sps:$4 sm:$0xff]   ;;  %v1848_v40 = vld [vmem:[%s2694_s2 + $0x400] ss:$16 sps:$4 sm:$0xff]  }
  0x2b   :  { %1123 = vmatpush2.bf16.msra.mxu0 %v1762_v42  ;;  %v1850_v37 = vld [vmem:[%s2694_s2 + $0x404] ss:$16 sps:$4 sm:$0xff]  }
  0x2c   :  { %1176 = vmatpush2.bf16.msra.mxu1 %v1763_v43  ;;  %1124 = vmatprep.subr.bf16.mxu0 %v1764_v44  ;;  %v190_v39 = vld [vmem:[%s2694_s2 + $0x500] sm:$0xff]  ;;  %v1857_v43 = vld [vmem:[%s2694_s2 + $0x1ec] ss:$16 sps:$4 sm:$0xff]  }
  0x2d   :  { %1177 = vmatprep.subr.bf16.mxu1 %v1766_v45  ;;  %v1681_v42 = vcombine.high %v190_v39, %v190_v39  ;;  %v1680_v44 = vcombine.low %v190_v39, %v190_v39  ;;  %v1855_v45 = vld [vmem:[%s2694_s2 + $0x1e8] ss:$16 sps:$4 sm:$0xff]  }
  0x2e   :  { %v1937_v39 = vld [vmem:[%s2694_s2 + $0x368] ss:$16 sps:$4 sm:$0xff]  }
  0x2f   :  { %1125 = vmatpush2.bf16.msra.mxu0 %v1768_v46  ;;  %v1091_v46 = vsel %vm1089_vm1, %v1680_v44, 0  ;;  %v1946_v44 = vld [vmem:[%s2694_s2 + $0x428] ss:$16 sps:$4 sm:$0xff]  }
  0x30   :  { %1178 = vmatpush2.bf16.msra.mxu1 %v1769_v47  ;;  %1126 = vmatprep.subr.bf16.mxu0 %v1770_v48  ;;  %v1864_v47 = vld [vmem:[%s2694_s2 + $0x1cc] ss:$16 sps:$4 sm:$0xff]  }
  0x31   :  { %1179 = vmatprep.subr.bf16.mxu1 %v1772_v50  ;;  %v1867_v48 = vld [vmem:[%s2694_s2 + $0x2ec] ss:$16 sps:$4 sm:$0xff]   ;;  %v1862_v50 = vld [vmem:[%s2694_s2 + $0x1c8] ss:$16 sps:$4 sm:$0xff]  }
  0x33   :  { %1127 = vmatpush2.bf16.msra.mxu0 %v1774_v52  ;;  %v1865_v52 = vld [vmem:[%s2694_s2 + $0x2e8] ss:$16 sps:$4 sm:$0xff]  }
  0x34   :  { %1180 = vmatpush2.bf16.msra.mxu1 %v1775_v53  ;;  %1128 = vmatprep.subr.bf16.mxu0 %v1776_v54  ;;  %v1870_v53 = vld [vmem:[%s2694_s2 + $0x1ac] ss:$16 sps:$4 sm:$0xff]  }
  0x35   :  { %1181 = vmatprep.subr.bf16.mxu1 %v1778_v55  ;;  %v1873_v54 = vld [vmem:[%s2694_s2 + $0x2cc] ss:$16 sps:$4 sm:$0xff]  }
  0x36   :  { %v2398_v55 = vld [vmem:[%s2695_s0 + $0x44] ss:$24 sps:$4 sm:$0xff]  }
  0x37   :  { %1129 = vmatpush2.bf16.msra.mxu0 %v1780_v56  ;;  %v1868_v56 = vld [vmem:[%s2694_s2 + $0x1a8] ss:$16 sps:$4 sm:$0xff]  }
  0x38   :  { %1182 = vmatpush2.bf16.msra.mxu1 %v1781_v57  ;;  %1130 = vmatprep.subr.bf16.mxu0 %v1782_v58  ;;  %v1871_v57 = vld [vmem:[%s2694_s2 + $0x2c8] ss:$16 sps:$4 sm:$0xff]   ;;  %v1879_v58 = vld [vmem:[%s2694_s2 + $0x18c] ss:$16 sps:$4 sm:$0xff]  }
  0x39   :  { %1183 = vmatprep.subr.bf16.mxu1 %v1784_v59  ;;  %v1882_v59 = vld [vmem:[%s2694_s2 + $0x2ac] ss:$16 sps:$4 sm:$0xff]  }
  0x3b   :  { %1131 = vmatpush2.bf16.msra.mxu0 %v1786_v60  ;;  %v2418_v60 = vld [vmem:[%s2695_s0 + $0x40] ss:$24 sps:$4 sm:$0xff]  }
  0x3c   :  { %1184 = vmatpush2.bf16.msra.mxu1 %v1787_v61  ;;  %1132 = vmatprep.subr.bf16.mxu0 %v1788_v62  ;;  %v1877_v61 = vld [vmem:[%s2694_s2 + $0x188] ss:$16 sps:$4 sm:$0xff]  }
  0x3d   :  { %1185 = vmatprep.subr.bf16.mxu1 %v1790_v63  ;;  %v1880_v62 = vld [vmem:[%s2694_s2 + $0x2a8] ss:$16 sps:$4 sm:$0xff]   ;;  %v1885_v63 = vld [vmem:[%s2694_s2 + $0x16c] ss:$16 sps:$4 sm:$0xff]  }
  0x3f   :  { %1133 = vmatpush2.bf16.msra.mxu0 %v1792_v0  ;;  %v1888_v0 = vld [vmem:[%s2694_s2 + $0x28c] ss:$16 sps:$4 sm:$0xff]  }
  0x40   :  { %1186 = vmatpush2.bf16.msra.mxu1 %v1793_v1  ;;  %1208 = vmatprep.subr.bf16.mxu0 %v1802_v2  ;;  %v1883_v1 = vld [vmem:[%s2694_s2 + $0x168] ss:$16 sps:$4 sm:$0xff]  }
  0x41   :  { %1261 = vmatprep.subr.bf16.mxu1 %v1805_v3  ;;  %v1886_v2 = vld [vmem:[%s2694_s2 + $0x288] ss:$16 sps:$4 sm:$0xff]   ;;  %v1891_v3 = vld [vmem:[%s2694_s2 + $0x14c] ss:$16 sps:$4 sm:$0xff]  }
  0x42   :  { %1135 = vmatmul.mubr.bf16.vlgmr.msra.gmra.mxu0 %v2230_v4 }
  0x43   :  { %1188 = vmatmul.mubr.bf16.vlgmr.msra.gmra.mxu1 %v2235_v5  ;;  %1209 = vmatpush1.bf16.msra.mxu0 %v1800_v6  ;;  %v1894_v6 = vld [vmem:[%s2694_s2 + $0x26c] ss:$16 sps:$4 sm:$0xff]  }
  0x44   :  { %1262 = vmatpush1.bf16.msra.mxu1 %v1803_v7  ;;  %1210 = vmatprep.subr.bf16.mxu0 %v1808_v8  ;;  %v1889_v7 = vld [vmem:[%s2694_s2 + $0x148] ss:$16 sps:$4 sm:$0xff]  }
  0x45   :  { %1263 = vmatprep.subr.bf16.mxu1 %v1811_v9  ;;  %1144 = vmatprep.mubr.bf16.mxu0 %v2252_v10  ;;  %v1892_v8 = vld [vmem:[%s2694_s2 + $0x268] ss:$16 sps:$4 sm:$0xff]   ;;  %v1897_v9 = vld [vmem:[%s2694_s2 + $0x12c] ss:$16 sps:$4 sm:$0xff]  }
  0x46   :  { %1197 = vmatprep.mubr.bf16.mxu1 %v2257_v11 }
  0x47   :  { %1211 = vmatpush1.bf16.msra.mxu0 %v1806_v12  ;;  %v1895_v12 = vld [vmem:[%s2694_s2 + $0x128] ss:$16 sps:$4 sm:$0xff]  }
  0x48   :  { %1264 = vmatpush1.bf16.msra.mxu1 %v1809_v13  ;;  %1212 = vmatprep.subr.bf16.mxu0 %v1814_v14  ;;  %v1898_v13 = vld [vmem:[%s2694_s2 + $0x248] ss:$16 sps:$4 sm:$0xff]   ;;  %v1903_v14 = vld [vmem:[%s2694_s2 + $0x10c] ss:$16 sps:$4 sm:$0xff]  }
  0x49   :  { %1265 = vmatprep.subr.bf16.mxu1 %v1817_v15  ;;  %v1906_v15 = vld [vmem:[%s2694_s2 + $0x22c] ss:$16 sps:$4 sm:$0xff]  }
  0x4a   :  { %1145 = vmatmul.mubr.bf16.gmra.mxu0 %v2280_v17 }
  0x4b   :  { %1198 = vmatmul.mubr.bf16.gmra.mxu1 %v2286_v18  ;;  %1213 = vmatpush1.bf16.msra.mxu0 %v1812_v16  ;;  %v1901_v16 = vld [vmem:[%s2694_s2 + $0x108] ss:$16 sps:$4 sm:$0xff]  }
  0x4c   :  { %1266 = vmatpush1.bf16.msra.mxu1 %v1815_v19  ;;  %1214 = vmatprep.subr.bf16.mxu0 %v1820_v20  ;;  %v1904_v19 = vld [vmem:[%s2694_s2 + $0x228] ss:$16 sps:$4 sm:$0xff]   ;;  %v1909_v20 = vld [vmem:[%s2694_s2 + $0x20c] ss:$16 sps:$4 sm:$0xff]  }
  0x4d   :  { %1267 = vmatprep.subr.bf16.mxu1 %v1823_v21  ;;  %1685 = vmatprep.mubr.msk.bf16.mxu0 %vm1082_vm0, %v2300_v22  ;;  %v1912_v21 = vld [vmem:[%s2694_s2 + $0x4ec] ss:$16 sps:$4 sm:$0xff]  }
  0x4e   :  { %1293 = vmatprep.mubr.bf16.mxu1 %v2167_v49  ;;  %v2381_v49 = vld [vmem:[%s2695_s0 + $0x10] ss:$24 sps:$4 sm:$0xff]  }
  0x4f   :  { %1215 = vmatpush1.bf16.msra.mxu0 %v1818_v23  ;;  %v1907_v23 = vld [vmem:[%s2694_s2 + $0x208] ss:$16 sps:$4 sm:$0xff]  }
  0x50   :  { %1268 = vmatpush1.bf16.msra.mxu1 %v1821_v24  ;;  %1216 = vmatprep.subr.bf16.mxu0 %v1826_v25  ;;  %v1910_v24 = vld [vmem:[%s2694_s2 + $0x4e8] ss:$16 sps:$4 sm:$0xff]   ;;  %v1915_v25 = vld [vmem:[%s2694_s2 + $0x3ec] ss:$16 sps:$4 sm:$0xff]  }
  0x51   :  { %1269 = vmatprep.subr.bf16.mxu1 %v1829_v26  ;;  %v1918_v26 = vld [vmem:[%s2694_s2 + $0x4cc] ss:$16 sps:$4 sm:$0xff]  }
  0x53   :  { %1217 = vmatpush1.bf16.msra.mxu0 %v1824_v27  ;;  %v1913_v27 = vld [vmem:[%s2694_s2 + $0x3e8] ss:$16 sps:$4 sm:$0xff]  }
  0x54   :  { %1270 = vmatpush1.bf16.msra.mxu1 %v1827_v28  ;;  %1218 = vmatprep.subr.bf16.mxu0 %v1832_v29  ;;  %v1916_v28 = vld [vmem:[%s2694_s2 + $0x4c8] ss:$16 sps:$4 sm:$0xff]   ;;  %v1921_v29 = vld [vmem:[%s2694_s2 + $0x3cc] ss:$16 sps:$4 sm:$0xff]  }
  0x55   :  { %1271 = vmatprep.subr.bf16.mxu1 %v1835_v30  ;;  %v1919_v30 = vld [vmem:[%s2694_s2 + $0x3c8] ss:$16 sps:$4 sm:$0xff]  }
  0x57   :  { %1219 = vmatpush1.bf16.msra.mxu0 %v1830_v31  ;;  %v1922_v31 = vld [vmem:[%s2694_s2 + $0x4a8] ss:$16 sps:$4 sm:$0xff]  }
  0x58   :  { %1272 = vmatpush1.bf16.msra.mxu1 %v1833_v32  ;;  %1220 = vmatprep.subr.bf16.mxu0 %v1843_v33  ;;  %v1927_v32 = vld [vmem:[%s2694_s2 + $0x3ac] ss:$16 sps:$4 sm:$0xff]   ;;  %v1925_v33 = vld [vmem:[%s2694_s2 + $0x3a8] ss:$16 sps:$4 sm:$0xff]  }
  0x59   :  { %1273 = vmatprep.subr.bf16.mxu1 %v1846_v34  ;;  %v1928_v34 = vld [vmem:[%s2694_s2 + $0x488] ss:$16 sps:$4 sm:$0xff]  }
  0x5b   :  { %1221 = vmatpush1.bf16.msra.mxu0 %v1841_v35  ;;  %v1933_v35 = vld [vmem:[%s2694_s2 + $0x38c] ss:$16 sps:$4 sm:$0xff]  }
  0x5c   :  { %1274 = vmatpush1.bf16.msra.mxu1 %v1844_v36  ;;  %1222 = vmatprep.subr.bf16.mxu0 %v1850_v37  ;;  %v1931_v36 = vld [vmem:[%s2694_s2 + $0x388] ss:$16 sps:$4 sm:$0xff]  }
  0x5d   :  { %1275 = vmatprep.subr.bf16.mxu1 %v1853_v38  ;;  %v1934_v37 = vld [vmem:[%s2694_s2 + $0x468] ss:$16 sps:$4 sm:$0xff]   ;;  %v1939_v38 = vld [vmem:[%s2694_s2 + $0x36c] ss:$16 sps:$4 sm:$0xff]  }
  0x5f   :  { %1223 = vmatpush1.bf16.msra.mxu0 %v1848_v40  ;;  %v1940_v40 = vld [vmem:[%s2694_s2 + $0x448] ss:$16 sps:$4 sm:$0xff]  }
  0x60   :  { %1276 = vmatpush1.bf16.msra.mxu1 %v1851_v41  ;;  %1684 = vmatprep.subr.msk.bf16.mxu0 %vm1089_vm1, %v1681_v42  ;;  %v1945_v41 = vld [vmem:[%s2694_s2 + $0x34c] ss:$16 sps:$4 sm:$0xff]  }
  0x61   :  { %1277 = vmatprep.subr.bf16.mxu1 %v1857_v43  ;;  %v1948_v42 = vld [vmem:[%s2694_s2 + $0x42c] ss:$16 sps:$4 sm:$0xff]   ;;  %v1943_v43 = vld [vmem:[%s2694_s2 + $0x348] ss:$16 sps:$4 sm:$0xff]  }
  0x63   :  { %1239 = vmatpush2.bf16.msra.mxu0 %v1091_v46  ;;  %v1954_v46 = vld [vmem:[%s2694_s2 + $0x40c] ss:$16 sps:$4 sm:$0xff]  }
  0x64   :  { %1278 = vmatpush2.bf16.msra.mxu1 %v1855_v45  ;;  %1314 = vmatprep.subr.bf16.mxu0 %v1867_v48  ;;  %v1951_v45 = vld [vmem:[%s2694_s2 + $0x32c] ss:$16 sps:$4 sm:$0xff]   ;;  %v1949_v48 = vld [vmem:[%s2694_s2 + $0x328] ss:$16 sps:$4 sm:$0xff]  }
  0x65   :  { %1279 = vmatprep.subr.bf16.mxu1 %v1864_v47  ;;  %v191_v47 = vld [vmem:[%s2694_s2 + $0x508] sm:$0xff] }
  0x66   :  { %1241 = vmatmul.mubr.bf16.vlgmr.msra.gmra.mxu0 %v2381_v49 }
  0x67   :  { %1315 = vmatpush1.bf16.msra.mxu0 %v1865_v52  ;;  %1686 = vmatprep.mubr.msk.bf16.mxu0 %vm1082_vm0, %v2398_v55  ;;  %v1957_v52 = vld [vmem:[%s2694_s2 + $0x30c] ss:$16 sps:$4 sm:$0xff]  }
  0x68   :  { %1280 = vmatpush2.bf16.msra.mxu1 %v1862_v50  ;;  %1316 = vmatprep.subr.bf16.mxu0 %v1873_v54  ;;  %v1952_v50 = vld [vmem:[%s2694_s2 + $0x408] ss:$16 sps:$4 sm:$0xff]   ;;  %v1682_v54 = vcombine.low %v191_v47, %v191_v47 }
  0x69   :  { %1281 = vmatprep.subr.bf16.mxu1 %v1870_v53  ;;  %v1683_v53 = vcombine.high %v191_v47, %v191_v47 }
  0x6b   :  { %1317 = vmatpush1.bf16.msra.mxu0 %v1871_v57  ;;  %v1097_v57 = vsel %vm1089_vm1, %v1682_v54, 0 }
  0x6c   :  { %1282 = vmatpush2.bf16.msra.mxu1 %v1868_v56  ;;  %1318 = vmatprep.subr.bf16.mxu0 %v1882_v59  ;;  %v1955_v56 = vld [vmem:[%s2694_s2 + $0x308] ss:$16 sps:$4 sm:$0xff]  }
  0x6d   :  { %1283 = vmatprep.subr.bf16.mxu1 %v1879_v58  ;;  %v194_v58 = vlaneseq }
  0x6e   :  { %1251 = vmatmul.mubr.bf16.gmra.mxu0 %v2418_v60 }
  0x6f   :  { %1319 = vmatpush1.bf16.msra.mxu0 %v1880_v62  ;;  %1346 = vmatprep.mubr.bf16.mxu0 %v2175_v51  ;;  %v1900_v51 = vld [vmem:[%s2694_s2 + $0x24c] ss:$16 sps:$4 sm:$0xff]   ;;  %v2595_v59 = vshrl.u32 %v194_v58, 7 }
  0x70   :  { %1284 = vmatpush2.bf16.msra.mxu1 %v1877_v61  ;;  %1320 = vmatprep.subr.bf16.mxu0 %v1888_v0 }
  0x71   :  { %1285 = vmatprep.subr.bf16.mxu1 %v1885_v63  ;;  %v196_v61 = vsub.s32 0, %v2595_v59 }
  0x73   :  { %1321 = vmatpush1.bf16.msra.mxu0 %v1886_v2 }
  0x74   :  { %1286 = vmatpush2.bf16.msra.mxu1 %v1883_v1  ;;  %1322 = vmatprep.subr.bf16.mxu0 %v1894_v6 }
  0x75   :  { %1287 = vmatprep.subr.bf16.mxu1 %v1891_v3 }
  0x77   :  { %1323 = vmatpush1.bf16.msra.mxu0 %v1892_v8 }
  0x78   :  { %1288 = vmatpush2.bf16.msra.mxu1 %v1889_v7  ;;  %1324 = vmatprep.subr.bf16.mxu0 %v1900_v51 }
  0x79   :  { %1289 = vmatprep.subr.bf16.mxu1 %v1897_v9 }
  0x7b   :  { %1325 = vmatpush1.bf16.msra.mxu0 %v1898_v13 }
  0x7c   :  { %1290 = vmatpush2.bf16.msra.mxu1 %v1895_v12  ;;  %1326 = vmatprep.subr.bf16.mxu0 %v1906_v15 }
  0x7d   :  { %1291 = vmatprep.subr.bf16.mxu1 %v1903_v14 }
  0x7f   :  { %1327 = vmatpush1.bf16.msra.mxu0 %v1904_v19 }
  0x80   :  { %1292 = vmatpush2.bf16.msra.mxu1 %v1901_v16  ;;  %1328 = vmatprep.subr.bf16.mxu0 %v1909_v20 }
  0x81   :  { %1367 = vmatprep.subr.bf16.mxu1 %v1912_v21 }
  0x83   :  { %1294 = vmatmul.mubr.bf16.vlgmr.msra.gmra.mxu1 %v2230_v4  ;;  %1329 = vmatpush1.bf16.msra.mxu0 %v1907_v23  ;;  %v1924_v4 = vld [vmem:[%s2694_s2 + $0x4ac] ss:$16 sps:$4 sm:$0xff]  }
  0x84   :  { %1368 = vmatpush1.bf16.msra.mxu1 %v1910_v24  ;;  %1330 = vmatprep.subr.bf16.mxu0 %v1915_v25 }
  0x85   :  { %1369 = vmatprep.subr.bf16.mxu1 %v1918_v26  ;;  %1303 = vmatprep.mubr.bf16.mxu1 %v2252_v10  ;;  %v1930_v10 = vld [vmem:[%s2694_s2 + $0x48c] ss:$16 sps:$4 sm:$0xff]  }
  0x87   :  { %1331 = vmatpush2.bf16.msra.mxu0 %v1913_v27 }
  0x88   :  { %1370 = vmatpush1.bf16.msra.mxu1 %v1916_v28  ;;  %1332 = vmatprep.subr.bf16.mxu0 %v1921_v29 }
  0x89   :  { %1371 = vmatprep.subr.bf16.mxu1 %v1924_v4 }
  0x8b   :  { %1304 = vmatmul.mubr.bf16.gmra.mxu1 %v2280_v17  ;;  %1333 = vmatpush2.bf16.msra.mxu0 %v1919_v30  ;;  %v1936_v17 = vld [vmem:[%s2694_s2 + $0x46c] ss:$16 sps:$4 sm:$0xff]  }
  0x8c   :  { %1372 = vmatpush1.bf16.msra.mxu1 %v1922_v31  ;;  %1334 = vmatprep.subr.bf16.mxu0 %v1927_v32 }
  0x8d   :  { %1373 = vmatprep.subr.bf16.mxu1 %v1930_v10  ;;  %1688 = vmatprep.mubr.msk.bf16.mxu1 %vm1082_vm0, %v2300_v22  ;;  %v1942_v22 = vld [vmem:[%s2694_s2 + $0x44c] ss:$16 sps:$4 sm:$0xff]  }
  0x8f   :  { %1335 = vmatpush2.bf16.msra.mxu0 %v1925_v33 }
  0x90   :  { %1374 = vmatpush1.bf16.msra.mxu1 %v1928_v34  ;;  %1336 = vmatprep.subr.bf16.mxu0 %v1933_v35  ;;  %v204_v34 = vsub.s32 2, %v2595_v59  ;;  %v208_v35 = vsub.s32 3, %v2595_v59 }
  0x91   :  { %1375 = vmatprep.subr.bf16.mxu1 %v1936_v17 }
  0x93   :  { %1337 = vmatpush2.bf16.msra.mxu0 %v1931_v36 }
  0x94   :  { %1376 = vmatpush1.bf16.msra.mxu1 %v1934_v37  ;;  %1338 = vmatprep.subr.bf16.mxu0 %v1939_v38 }
  0x95   :  { %1377 = vmatprep.subr.bf16.mxu1 %v1942_v22 }
  0x97   :  { %1339 = vmatpush2.bf16.msra.mxu0 %v1937_v39 }
  0x98   :  { %1378 = vmatpush1.bf16.msra.mxu1 %v1940_v40  ;;  %1340 = vmatprep.subr.bf16.mxu0 %v1945_v41 }
  0x99   :  { %1379 = vmatprep.subr.bf16.mxu1 %v1948_v42 }
  0x9b   :  { %1341 = vmatpush2.bf16.msra.mxu0 %v1943_v43 }
  0x9c   :  { %1380 = vmatpush1.bf16.msra.mxu1 %v1946_v44  ;;  %1342 = vmatprep.subr.bf16.mxu0 %v1951_v45 }
  0x9d   :  { %1381 = vmatprep.subr.bf16.mxu1 %v1954_v46 }
  0x9f   :  { %1343 = vmatpush2.bf16.msra.mxu0 %v1949_v48 }
  0xa0   :  { %1382 = vmatpush1.bf16.msra.mxu1 %v1952_v50  ;;  %1344 = vmatprep.subr.bf16.mxu0 %v1957_v52 }
  0xa1   :  { %1687 = vmatprep.subr.msk.bf16.mxu1 %vm1089_vm1, %v1683_v53 }
  0xa3   :  { %1345 = vmatpush2.bf16.msra.mxu0 %v1955_v56 }
  0xa4   :  { %1398 = vmatpush2.bf16.msra.mxu1 %v1097_v57 }
  0xa6   :  { %1347 = vmatmul.mubr.bf16.vlgmr.msra.gmra.mxu0 %v2235_v5  ;;  %v2601_v5 = vld [vmem:[%s2696_s3] sm:$0xf] }
  0xa7   :  { %1400 = vmatmul.mubr.bf16.vlgmr.msra.gmra.mxu1 %v2381_v49  ;;  %1356 = vmatprep.mubr.bf16.mxu0 %v2257_v11  ;;  %v197_v49 = vrot.slane %v2601_v5, %v196_v61  ;;  %v205_v37 = vrot.slane %v2601_v5, %v204_v34  ;;  %v209_v38 = vrot.slane %v2601_v5, %v208_v35 }
  0xa8   :  { %1689 = vmatprep.mubr.msk.bf16.mxu1 %vm1082_vm0, %v2398_v55 }
  0xae   :  { %1357 = vmatmul.mubr.bf16.gmra.mxu0 %v2286_v18 }
  0xaf   :  { %1410 = vmatmul.mubr.bf16.gmra.mxu1 %v2418_v60 }
 0x102   :  { %v1136_v11 = vpop.f32.mrf.mxu0 }
 0x103   :  { %v1189_v62 = vpop.f32.mrf.mxu1  ;;  %v1137_v63 = vadd.f32 %v1136_v11, %v197_v49 }
 0x104   :  { %v2604_v55 = vpop.f32.mrf.mxu0 }
 0x105   :  { %v2606_v18 = vpop.f32.mrf.mxu1  ;;  %v2608_v60 = vadd.f32 %v1189_v62, %v1137_v63 }
 0x106   :  { %v1140_v0 = vpop.f32.mrf.mxu0 }
 0x107   :  { %v1193_v1 = vpop.f32.mrf.mxu1  ;;  %v1141_v2 = vadd.f32 %v1140_v0, %v197_v49 }
 0x108   :  { %v2610_v3 = vpop.f32.mrf.mxu0 }
 0x109   :  { %v2612_v6 = vpop.f32.mrf.mxu1  ;;  %v2614_v7 = vadd.f32 %v1193_v1, %v1141_v2 }
 0x10a   :  { %v1146_v8 = vpop.f32.mrf.mxu0 }
 0x10b   :  { %v1199_v9 = vpop.f32.mrf.mxu1  ;;  %v1147_v51 = vadd.f32 %v1146_v8, %v197_v49 }
 0x10c   :  { %v2616_v12 = vpop.f32.mrf.mxu0 }
 0x10d   :  { %v2618_v13 = vpop.f32.mrf.mxu1  ;;  %v2620_v14 = vadd.f32 %v1199_v9, %v1147_v51 }
 0x10e   :  { %v1150_v15 = vpop.f32.mrf.mxu0 }
 0x10f   :  { %v1151_v16 = vadd.f32 %v1150_v15, %v197_v49  ;;  %v1203_v19 = vpop.f32.mrf.mxu1 }
 0x110   :  { %v2624_v21 = vpop.f32.mrf.mxu0 }
 0x111   :  { %v2622_v20 = vadd.f32 %v1203_v19, %v1151_v16  ;;  %v2626_v23 = vpop.f32.mrf.mxu1 }
 0x126   :  { %v2628_v24 = vpop.f32.mrf.mxu0 }
 0x128   :  { %v2630_v26 = vpop.f32.mrf.mxu0 }
 0x12a   :  { %v2632_v28 = vpop.f32.mrf.mxu0 }
 0x12c   :  { %v2634_v4 = vpop.f32.mrf.mxu0 }
 0x12e   :  { %v2636_v31 = vpop.f32.mrf.mxu0 }
 0x130   :  { %v2638_v10 = vpop.f32.mrf.mxu0 }
 0x132   :  { %v2642_v17 = vpop.f32.mrf.mxu0 }
 0x134   :  { %v2646_v22 = vpop.f32.mrf.mxu0 }
 0x143   :  { %v1295_v25 = vpop.f32.mrf.mxu1 }
 0x144   :  { %v1296_v40 = vadd.f32 %v1295_v25, %v205_v37 }
 0x145   :  { %v1297_v27 = vpop.f32.mrf.mxu1 }
 0x146   :  { %v1298_v43 = vadd.f32 %v1297_v27, %v209_v38 }
 0x147   :  { %v1299_v29 = vpop.f32.mrf.mxu1 }
 0x148   :  { %v1300_v47 = vadd.f32 %v1299_v29, %v205_v37 }
 0x149   :  { %v1301_v30 = vpop.f32.mrf.mxu1 }
 0x14a   :  { %v1302_v54 = vadd.f32 %v1301_v30, %v209_v38 }
 0x14b   :  { %v1305_v32 = vpop.f32.mrf.mxu1 }
 0x14c   :  { %v1306_v61 = vadd.f32 %v1305_v32, %v205_v37 }
 0x14d   :  { %v1307_v33 = vpop.f32.mrf.mxu1 }
 0x14e   :  { %v1308_v1 = vadd.f32 %v1307_v33, %v209_v38 }
 0x14f   :  { %v1309_v36 = vpop.f32.mrf.mxu1 }
 0x150   :  { %v1310_v16 = vadd.f32 %v1309_v36, %v205_v37 }
 0x151   :  { %v1311_v39 = vpop.f32.mrf.mxu1 }
 0x152   :  { %v1312_v32 = vadd.f32 %v1311_v39, %v209_v38  ;;  %v200_v39 = vsub.s32 1, %v2595_v59 }
 0x166   :  { %v1348_v41 = vpop.f32.mrf.mxu0 }
 0x167   :  { %v1401_v42 = vpop.f32.mrf.mxu1  ;;  %v1349_v44 = vadd.f32 %v1348_v41, %v1296_v40 }
 0x168   :  { %v1350_v45 = vpop.f32.mrf.mxu0 }
 0x169   :  { %v1403_v46 = vpop.f32.mrf.mxu1  ;;  %v1402_v48 = vadd.f32 %v1401_v42, %v1349_v44  ;;  %v1351_v50 = vadd.f32 %v1350_v45, %v1298_v43 }
 0x16a   :  { %v1352_v52 = vpop.f32.mrf.mxu0 }
 0x16b   :  { %v1405_v53 = vpop.f32.mrf.mxu1  ;;  %v1690_v56 = vmul.f32 -1.442695, %v1402_v48  ;;  %v1404_v57 = vadd.f32 %v1403_v46, %v1351_v50  ;;  %v1353_v58 = vadd.f32 %v1352_v52, %v1300_v47 }
 0x16c   :  { %v1354_v49 = vpop.f32.mrf.mxu0 }
 0x16d   :  { %v1407_v11 = vpop.f32.mrf.mxu1  ;;  %1960 = vpow2.f32 %v1690_v56  ;;  %v1694_v62 = vmul.f32 -1.442695, %v1404_v57  ;;  %v1406_v63 = vadd.f32 %v1405_v53, %v1353_v58  ;;  %v1355_v0 = vadd.f32 %v1354_v49, %v1302_v54 }
 0x16e   :  { %v1358_v2 = vpop.f32.mrf.mxu0  ;;  %v201_v56 = vrot.slane %v2601_v5, %v200_v39 }
 0x16f   :  { %v1411_v8 = vpop.f32.mrf.mxu1  ;;  %1962 = vpow2.f32 %v1694_v62  ;;  %v1691_v9 = vmul.f32 -1.442695, %v1406_v63  ;;  %v1408_v51 = vadd.f32 %v1407_v11, %v1355_v0  ;;  %v1359_v15 = vadd.f32 %v1358_v2, %v1306_v61 }
 0x170   :  { %v1360_v19 = vpop.f32.mrf.mxu0  ;;  %v1139_v11 = vadd.f32 %v2604_v55, %v201_v56  ;;  %v1143_v2 = vadd.f32 %v2610_v3, %v201_v56 }
 0x171   :  { %v1413_v25 = vpop.f32.mrf.mxu1  ;;  %1964 = vpow2.f32 %v1691_v9  ;;  %v1695_v27 = vmul.f32 -1.442695, %v1408_v51  ;;  %v1412_v29 = vadd.f32 %v1411_v8, %v1359_v15  ;;  %v1361_v30 = vadd.f32 %v1360_v19, %v1308_v1 }
 0x172   :  { %v1362_v34 = vpop.f32.mrf.mxu0  ;;  %v1192_v1 = vadd.f32 %v2606_v18, %v1139_v11  ;;  %v1149_v15 = vadd.f32 %v2616_v12, %v201_v56  ;;  %v1196_v55 = vadd.f32 %v2612_v6, %v1143_v2  ;;  %v1480_v12 = vld [vmem:[%s2697_s1] sm:$0xff]  ;;  %v1247_v6 = vadd.f32 %v2632_v28, %v2614_v7 }
 0x173   :  { %v1415_v35 = vpop.f32.mrf.mxu1  ;;  %1966 = vpow2.f32 %v1695_v27  ;;  %v1692_v40 = vmul.f32 -1.442695, %v1412_v29  ;;  %v1414_v41 = vadd.f32 %v1413_v25, %v1361_v30  ;;  %v1363_v33 = vadd.f32 %v1362_v34, %v1310_v16 }
 0x174   :  { %v1364_v42 = vpop.f32.mrf.mxu0  ;;  %v1245_v9 = vadd.f32 %v2630_v26, %v1192_v1  ;;  %v1243_v16 = vadd.f32 %v2628_v24, %v2608_v60  ;;  %v1249_v18 = vadd.f32 %v2634_v4, %v1196_v55  ;;  %v1202_v29 = vadd.f32 %v2618_v13, %v1149_v15 }
 0x175   :  { %1968 = vpow2.f32 %v1692_v40  ;;  %v1696_v43 = vmul.f32 -1.442695, %v1414_v41  ;;  %v1416_v44 = vadd.f32 %v1415_v35, %v1363_v33  ;;  %v1365_v45 = vadd.f32 %v1364_v42, %v1312_v32  ;;  %v1417_v46 = vpop.f32.mrf.mxu1  ;;  %v1481_v33 = vld [vmem:[%s2697_s1 + $0x8] sm:$0xff] }
 0x176   :  { %v1153_v26 = vadd.f32 %v2624_v21, %v201_v56  ;;  %v1255_v34 = vadd.f32 %v2638_v10, %v1202_v29  ;;  %v1253_v21 = vadd.f32 %v2636_v31, %v2620_v14  ;;  %v1257_v14 = vadd.f32 %v2642_v17, %v2622_v20  ;;  %v1482_v31 = vld [vmem:[%s2697_s1 + $0x10] sm:$0xff]  ;;  %v1483_v20 = vld [vmem:[%s2697_s1 + $0x18] sm:$0xff] }
 0x177   :  { %1970 = vpow2.f32 %v1696_v43  ;;  %v1693_v36 = vmul.f32 -1.442695, %v1416_v44  ;;  %v1418_v37 = vadd.f32 %v1417_v46, %v1365_v45 }
 0x178   :  { %v1206_v13 = vadd.f32 %v2626_v23, %v1153_v26 }
 0x179   :  { %1972 = vpow2.f32 %v1693_v36  ;;  %v1697_v47 = vmul.f32 -1.442695, %v1418_v37 }
 0x17a   :  { %v1961_v48 = vpop.eup %1960  ;;  %v1259_v10 = vadd.f32 %v2646_v22, %v1206_v13 }
 0x17b   :  { %1974 = vpow2.f32 %v1697_v47  ;;  %v1432_v50 = vadd.f32 1.0, %v1961_v48 }
 0x17c   :  { %v1963_v38 = vpop.eup %1962 }
 0x17d   :  { %v1456_v52 = vadd.f32 1.0, %v1963_v38 }
 0x17e   :  { %v1965_v53 = vpop.eup %1964 }
 0x17f   :  { %1976 = vrcp.f32 %v1456_v52  ;;  %v1433_v57 = vadd.f32 1.0, %v1965_v53 }
 0x180   :  { %v1967_v54 = vpop.eup %1966  ;;  %1978 = vrcp.f32 %v1432_v50 }
 0x181   :  { %v1457_v58 = vadd.f32 1.0, %v1967_v54 }
 0x182   :  { %v1969_v61 = vpop.eup %1968 }
 0x183   :  { %1980 = vrcp.f32 %v1457_v58  ;;  %v1434_v62 = vadd.f32 1.0, %v1969_v61 }
 0x184   :  { %v1971_v49 = vpop.eup %1970  ;;  %1982 = vrcp.f32 %v1433_v57 }
 0x185   :  { %v1458_v63 = vadd.f32 1.0, %v1971_v49 }
 0x186   :  { %v1973_v0 = vpop.eup %1972 }
 0x187   :  { %1984 = vrcp.f32 %v1458_v63  ;;  %v1435_v5 = vadd.f32 1.0, %v1973_v0 }
 0x188   :  { %v1975_v59 = vpop.eup %1974  ;;  %1986 = vrcp.f32 %v1434_v62 }
 0x189   :  { %v1459_v8 = vadd.f32 1.0, %v1975_v59 }
 0x18b   :  { %1988 = vrcp.f32 %v1459_v8 }
 0x18c   :  { %v1977_v51 = vpop.eup %1976  ;;  %1990 = vrcp.f32 %v1435_v5 }
 0x18d   :  { %v1468_v19 = vmul.f32 %v1977_v51, %v1245_v9  ;;  %v1979_v25 = vpop.eup %1978 }
 0x18e   :  { %v1488_v30 = vsub.f32 1.0, %v1979_v25  ;;  %v1484_v4 = vmul.f32 %v1979_v25, %v1480_v12 }
 0x18f   :  { %v1472_v3 = vadd.f32 %v1468_v19, %v1243_v16 }
 0x190   :  { %v1981_v27 = vpop.eup %1980 }
 0x191   :  { %v1476_v60 = vmax.f32 %v1472_v3, 0.0  ;;  %v1469_v24 = vmul.f32 %v1981_v27, %v1249_v18  ;;  %v1983_v32 = vpop.eup %1982 }
 0x192   :  { %v1489_v28 = vsub.f32 1.0, %v1983_v32  ;;  %v1485_v45 = vmul.f32 %v1983_v32, %v1481_v33 }
 0x193   :  { %v1492_v35 = vmul.f32 %v1488_v30, %v1476_v60  ;;  %v1473_v40 = vadd.f32 %v1469_v24, %v1247_v6 }
 0x194   :  { %v1985_v41 = vpop.eup %1984 }
 0x195   :  { %v1496_v7 = vadd.f32 %v1492_v35, %v1484_v4  ;;  %v1477_v42 = vmax.f32 %v1473_v40, 0.0  ;;  %v1470_v43 = vmul.f32 %v1985_v41, %v1255_v34  ;;  %v1987_v44 = vpop.eup %1986 }
 0x196   :  { %v1490_v47 = vsub.f32 1.0, %v1987_v44  ;;  %v1486_v39 = vmul.f32 %v1987_v44, %v1482_v31 }
 0x197   :  { %1500 = vst [vmem:[%s2698_s4] sm:$0xff] %v1496_v7  ;;  %v1493_v23 = vmul.f32 %v1489_v28, %v1477_v42  ;;  %v1474_v46 = vadd.f32 %v1470_v43, %v1253_v21 }
 0x198   :  { %v1989_v36 = vpop.eup %1988 }
 0x199   :  { %v1497_v37 = vadd.f32 %v1493_v23, %v1485_v45  ;;  %v1478_v48 = vmax.f32 %v1474_v46, 0.0  ;;  %v1471_v38 = vmul.f32 %v1989_v36, %v1259_v10  ;;  %v1991_v22 = vpop.eup %1990 }
 0x19a   :  { %v1491_v53 = vsub.f32 1.0, %v1991_v22  ;;  %v1487_v56 = vmul.f32 %v1991_v22, %v1483_v20 }
 0x19b   :  { %1501 = vst [vmem:[%s2698_s4 + $0x8] sm:$0xff] %v1497_v37  ;;  %v1494_v50 = vmul.f32 %v1490_v47, %v1478_v48  ;;  %v1475_v52 = vadd.f32 %v1471_v38, %v1257_v14 }
 0x19d   :  { %v1498_v17 = vadd.f32 %v1494_v50, %v1486_v39  ;;  %v1479_v54 = vmax.f32 %v1475_v52, 0.0 }
 0x19f   :  { %1502 = vst [vmem:[%s2698_s4 + $0x10] sm:$0xff] %v1498_v17  ;;  %v1495_v57 = vmul.f32 %v1491_v53, %v1479_v54 }
 0x1a1   :  { %v1499_v58 = vadd.f32 %v1495_v57, %v1487_v56 }
 0x1a3   :  { %1503 = vst [vmem:[%s2698_s4 + $0x18] sm:$0xff] %v1499_v58 }

</bundles_post_ra>
